<compile_context>
chip_gen: v7x
topology: tpu7x:2x2x1
jax: 0.10.0
libtpu: 0.0.40
codegen_flags: <defaults>
</compile_context>

<pallas_src>
import functools

import jax
import jax.numpy as jnp
from jax.experimental import pallas as pl
from jax.experimental.pallas import tpu as pltpu


def _make_resnet_block_kernel(N, H, WC_in, WC_out):
    """Builds the fused BN -> ReLU -> 3x3 conv -> [conv | x] kernel for static shapes."""
    M = N * H

    def kernel(x_ref, w_ref, aff_ref, o_ref, a_cat):
        # x_ref:   (M, WC_in)           whole batch, rows = (n, h), lanes = w*C_in + c
        # w_ref:   (3*WC_in, WC_out)    stacked block-Toeplitz conv weights (K = 192)
        # aff_ref: (2, WC_in)           row 0: BN scale, row 1: BN shift (tiled over W)
        # o_ref:   (M, WC_out + WC_in)  lanes [0:WC_out] conv out, [WC_out:] x passthrough
        # a_cat:   (M, 3*WC_in)         VMEM scratch: [act(h-1) | act(h) | act(h+1)] per row

        # BatchNorm (precomputed affine) + ReLU, lane-dense elementwise phase.
        act = jnp.maximum(x_ref[...] * aff_ref[0:1, :] + aff_ref[1:2, :], 0.0)   # (M, WC_in)

        # Assemble the K = 3*WC_in conv operand: three height-shifted copies of `act`.
        a_cat[:, WC_in:2 * WC_in] = act                          # kh = 1 (center row)
        a_cat[1:M, 0:WC_in] = act[0:M - 1, :]                    # kh = 0 (row h-1)
        a_cat[0:M - 1, 2 * WC_in:3 * WC_in] = act[1:M, :]        # kh = 2 (row h+1)

        # Zero ONLY the 1-row height halo of each image (top row of the kh=0 block and
        # bottom row of the kh=2 block, which otherwise bleed across image boundaries).
        zrow = jnp.zeros((1, WC_in), jnp.float32)
        for n in range(N):                                       # static unroll, N is tiny
            a_cat[n * H:n * H + 1, 0:WC_in] = zrow
            a_cat[(n + 1) * H - 1:(n + 1) * H, 2 * WC_in:3 * WC_in] = zrow

        # One MXU matmul: (M, 3*WC_in) @ (3*WC_in, WC_out). Width padding is baked into
        # the Toeplitz weights; row-tap accumulation happens in the MXU f32 accumulator.
        conv = jnp.dot(a_cat[...], w_ref[...], preferred_element_type=jnp.float32)

        o_ref[:, 0:WC_out] = conv.astype(o_ref.dtype)            # lanes 0..127: conv result
        o_ref[:, WC_out:WC_out + WC_in] = x_ref[...]             # exact residual passthrough

    return kernel


@jax.jit
def resnet_block_forward(x_nchw, conv_w_oihw, bn_gamma, bn_beta, eps=1e-5):
    """Forward of ResNetBlock: cat([x, conv3x3(relu(bn(x)))], channel dim)."""
    N, C_in, H, W = x_nchw.shape
    C_out = conv_w_oihw.shape[0]
    WC_in, WC_out = W * C_in, W * C_out
    M = N * H

    # BatchNorm batch statistics (PyTorch training mode: biased variance, per channel).
    mean = jnp.mean(x_nchw, axis=(0, 2, 3))
    var = jnp.var(x_nchw, axis=(0, 2, 3))
    scale = bn_gamma / jnp.sqrt(var + eps)                       # (C_in,)
    shift = bn_beta - mean * scale                               # (C_in,)
    bn_aff = jnp.stack([jnp.tile(scale, W),
                        jnp.tile(shift, W)]).astype(jnp.float32)  # (2, W*C_in)

    # Input layout: NCHW -> NHWC -> (N*H, W*C_in) so the kernel is lane-dense.
    x_lane = jnp.transpose(x_nchw, (0, 2, 3, 1)).reshape(M, WC_in).astype(jnp.float32)

    # conv weights -> stacked block-Toeplitz matrix with K = 3*W*C_in:
    #   w_big[kh*W*C_in + w_in*C_in + c, w_out*C_out + o] = W[o, c, kh, w_in - w_out + 1]
    # (zero outside |w_in - w_out| <= 1, which also implements the width padding=1).
    # TODO(synk): the Toeplitz weights scale as 3*W^2*C_in*C_out*4B; at realistic ResNet
    # shapes they overflow VMEM (v7x's 64 MiB first) -- switch to per-column-tap matmuls
    # (pltpu.roll / shifted lane slices) or W-tiling if this kernel must generalize.
    w_hwio = jnp.transpose(conv_w_oihw, (2, 3, 1, 0)).astype(jnp.float32)    # (3, 3, Ci, Co)
    wi = jnp.arange(W)[:, None]
    wo = jnp.arange(W)[None, :]
    dw = wi - wo + 1
    valid = (dw >= 0) & (dw <= 2)
    blocks = jnp.where(valid[None, :, :, None, None],
                       w_hwio[:, jnp.clip(dw, 0, 2)], 0.0)                   # (3, W, W, Ci, Co)
    w_big = blocks.transpose(0, 1, 3, 2, 4).reshape(3 * WC_in, WC_out)

    kernel = _make_resnet_block_kernel(N, H, WC_in, WC_out)

    out_lane = pl.pallas_call(
        kernel,
        out_shape=jax.ShapeDtypeStruct((M, WC_out + WC_in), jnp.float32),
        grid_spec=pltpu.PrefetchScalarGridSpec(
            num_scalar_prefetch=0,
            grid=(1,),                                  # single step: whole batch at once
            in_specs=[
                pl.BlockSpec((M, WC_in), lambda i: (0, 0)),
                pl.BlockSpec((3 * WC_in, WC_out), lambda i: (0, 0)),
                pl.BlockSpec((2, WC_in), lambda i: (0, 0)),
            ],
            out_specs=pl.BlockSpec((M, WC_out + WC_in), lambda i: (0, 0)),
            scratch_shapes=[pltpu.VMEM((M, 3 * WC_in), jnp.float32)],
        ),
        compiler_params=pltpu.CompilerParams(dimension_semantics=("arbitrary",)),
    )(x_lane, w_big, bn_aff)

    # Reassemble cat([x, conv], dim=1) in NCHW from the fused kernel output
    # (single reshape/concat/transpose fusion under jit; x is the exact passthrough).
    conv_nhwc = out_lane[:, :WC_out].reshape(N, H, W, C_out)
    x_nhwc = out_lane[:, WC_out:].reshape(N, H, W, C_in)
    full = jnp.concatenate([x_nhwc, conv_nhwc], axis=-1)         # (N, H, W, C_in + C_out)
    return jnp.transpose(full, (0, 3, 1, 2))                     # -> NCHW, channels [x, conv]


def _reference_forward(x_nchw, conv_w_oihw, bn_gamma, bn_beta, eps=1e-5):
    """Pure-JAX reference mirroring PyTorch BN(train) -> ReLU -> Conv2d -> cat."""
    mean = jnp.mean(x_nchw, axis=(0, 2, 3))
    var = jnp.var(x_nchw, axis=(0, 2, 3))
    xn = (x_nchw - mean[None, :, None, None]) / jnp.sqrt(var[None, :, None, None] + eps)
    a = jnp.maximum(xn * bn_gamma[None, :, None, None] + bn_beta[None, :, None, None], 0.0)
    conv = jax.lax.conv_general_dilated(
        a, conv_w_oihw, window_strides=(1, 1), padding="SAME",
        dimension_numbers=("NCHW", "OIHW", "NCHW"))
    return jnp.concatenate([x_nchw, conv], axis=1)


if __name__ == "__main__":
    # Small shapes consistent with the module: N=2, in_planes=4, H=W=16, out_planes=8.
    N, C_in, H, W, C_out = 2, 4, 16, 16, 8

    key = jax.random.PRNGKey(0)
    kx, kw = jax.random.split(key)

    x = jax.random.normal(kx, (N, C_in, H, W), dtype=jnp.float32)
    # Conv2d(in_planes, out_planes, 3, stride=1, padding=1, bias=False) weight;
    # BatchNorm2d(in_planes) default init: gamma=1, beta=0.
    conv_w = jax.random.normal(kw, (C_out, C_in, 3, 3), dtype=jnp.float32) * 0.1
    bn_gamma = jnp.ones((C_in,), dtype=jnp.float32)
    bn_beta = jnp.zeros((C_in,), dtype=jnp.float32)

    out = resnet_block_forward(x, conv_w, bn_gamma, bn_beta)
    out = jax.block_until_ready(out)

    ref = _reference_forward(x, conv_w, bn_gamma, bn_beta)
    assert out.shape == (N, C_in + C_out, H, W)
    assert jnp.allclose(out, ref, atol=1e-4, rtol=1e-4), float(jnp.max(jnp.abs(out - ref)))

    print("KERNEL_OK")
</pallas_src>

<mosaic_0001>
module attributes {stable_mosaic.version = 11 : i64} {
  func.func @kernel(%arg0: i32, %arg1: memref<32x64xf32, #tpu.memory_space<vmem>>, %arg2: memref<192x128xf32, #tpu.memory_space<vmem>>, %arg3: memref<2x64xf32, #tpu.memory_space<vmem>>, %arg4: memref<32x192xf32, #tpu.memory_space<vmem>>, %arg5: memref<32x192xf32, #tpu.memory_space<vmem>>) attributes {dimension_semantics = [#tpu.dimension_semantics<arbitrary>], iteration_bounds = array<i64: 1>, scalar_prefetch = 0 : i64, scratch_operands = 1 : i64, tpu.core_type = #tpu.core_type<tc>, window_params = [{pipeline_mode = #tpu.pipeline_mode<synchronous>, transform_indices = @transform_0, window_bounds = array<i64: 32, 64>}, {pipeline_mode = #tpu.pipeline_mode<synchronous>, transform_indices = @transform_1, window_bounds = array<i64: 192, 128>}, {pipeline_mode = #tpu.pipeline_mode<synchronous>, transform_indices = @transform_2, window_bounds = array<i64: 2, 64>}, {pipeline_mode = #tpu.pipeline_mode<synchronous>, transform_indices = @transform_3, window_bounds = array<i64: 32, 192>}]} {
    %c0 = arith.constant 0 : index
    %c0_0 = arith.constant 0 : index
    %0 = vector.load %arg1[%c0, %c0_0] : memref<32x64xf32, #tpu.memory_space<vmem>>, vector<32x64xf32>
    %c0_1 = arith.constant 0 : index
    %c0_2 = arith.constant 0 : index
    %1 = vector.load %arg3[%c0_1, %c0_2] : memref<2x64xf32, #tpu.memory_space<vmem>>, vector<1x64xf32>
    %2 = vector.broadcast %1 : vector<1x64xf32> to vector<32x64xf32>
    %3 = arith.mulf %0, %2 : vector<32x64xf32>
    %c1 = arith.constant 1 : index
    %c0_3 = arith.constant 0 : index
    %4 = vector.load %arg3[%c1, %c0_3] : memref<2x64xf32, #tpu.memory_space<vmem>>, vector<1x64xf32>
    %5 = vector.broadcast %4 : vector<1x64xf32> to vector<32x64xf32>
    %6 = arith.addf %3, %5 : vector<32x64xf32>
    %cst = arith.constant 0.000000e+00 : f32
    %7 = vector.broadcast %cst : f32 to vector<32x64xf32>
    %8 = arith.maximumf %6, %7 : vector<32x64xf32>
    %c0_4 = arith.constant 0 : index
    %c64 = arith.constant 64 : index
    %9 = vector.load %arg5[%c0_4, %c64] : memref<32x192xf32, #tpu.memory_space<vmem>>, vector<32x64xf32>
    tpu.vector_store %arg5[%c0_4, %c64], %8 {strides = array<i32>} : memref<32x192xf32, #tpu.memory_space<vmem>>, vector<32x64xf32>,
    %10 = vector.extract_strided_slice %8 {offsets = [0, 0], sizes = [31, 64], strides = [1, 1]} : vector<32x64xf32> to vector<31x64xf32>
    %c1_5 = arith.constant 1 : index
    %c0_6 = arith.constant 0 : index
    %11 = vector.load %arg5[%c1_5, %c0_6] : memref<32x192xf32, #tpu.memory_space<vmem>>, vector<31x64xf32>
    tpu.vector_store %arg5[%c1_5, %c0_6], %10 {strides = array<i32>} : memref<32x192xf32, #tpu.memory_space<vmem>>, vector<31x64xf32>,
    %12 = vector.extract_strided_slice %8 {offsets = [1, 0], sizes = [31, 64], strides = [1, 1]} : vector<32x64xf32> to vector<31x64xf32>
    %c0_7 = arith.constant 0 : index
    %c128 = arith.constant 128 : index
    %13 = vector.load %arg5[%c0_7, %c128] : memref<32x192xf32, #tpu.memory_space<vmem>>, vector<31x64xf32>
    tpu.vector_store %arg5[%c0_7, %c128], %12 {strides = array<i32>} : memref<32x192xf32, #tpu.memory_space<vmem>>, vector<31x64xf32>,
    %cst_8 = arith.constant 0.000000e+00 : f32
    %14 = vector.broadcast %cst_8 : f32 to vector<1x64xf32>
    %c0_9 = arith.constant 0 : index
    %c0_10 = arith.constant 0 : index
    %15 = vector.load %arg5[%c0_9, %c0_10] : memref<32x192xf32, #tpu.memory_space<vmem>>, vector<1x64xf32>
    tpu.vector_store %arg5[%c0_9, %c0_10], %14 {strides = array<i32>} : memref<32x192xf32, #tpu.memory_space<vmem>>, vector<1x64xf32>,
    %c15 = arith.constant 15 : index
    %c128_11 = arith.constant 128 : index
    %16 = vector.load %arg5[%c15, %c128_11] : memref<32x192xf32, #tpu.memory_space<vmem>>, vector<1x64xf32>
    tpu.vector_store %arg5[%c15, %c128_11], %14 {strides = array<i32>} : memref<32x192xf32, #tpu.memory_space<vmem>>, vector<1x64xf32>,
    %c16 = arith.constant 16 : index
    %c0_12 = arith.constant 0 : index
    %17 = vector.load %arg5[%c16, %c0_12] : memref<32x192xf32, #tpu.memory_space<vmem>>, vector<1x64xf32>
    tpu.vector_store %arg5[%c16, %c0_12], %14 {strides = array<i32>} : memref<32x192xf32, #tpu.memory_space<vmem>>, vector<1x64xf32>,
    %c31 = arith.constant 31 : index
    %c128_13 = arith.constant 128 : index
    %18 = vector.load %arg5[%c31, %c128_13] : memref<32x192xf32, #tpu.memory_space<vmem>>, vector<1x64xf32>
    tpu.vector_store %arg5[%c31, %c128_13], %14 {strides = array<i32>} : memref<32x192xf32, #tpu.memory_space<vmem>>, vector<1x64xf32>,
    %c0_14 = arith.constant 0 : index
    %c0_15 = arith.constant 0 : index
    %19 = vector.load %arg5[%c0_14, %c0_15] : memref<32x192xf32, #tpu.memory_space<vmem>>, vector<32x192xf32>
    %c0_16 = arith.constant 0 : index
    %c0_17 = arith.constant 0 : index
    %20 = vector.load %arg2[%c0_16, %c0_17] : memref<192x128xf32, #tpu.memory_space<vmem>>, vector<192x128xf32>
    %cst_18 = arith.constant dense<0.000000e+00> : vector<32x128xf32>
    %21 = tpu.matmul %19, %20, %cst_18 {dimension_numbers = #tpu.dot_dimension_numbers<[1], [0], [0], [1], [0, 0, 1, 1], [], []>} : vector<32x192xf32>, vector<192x128xf32>, vector<32x128xf32> -> vector<32x128xf32>
    %c0_19 = arith.constant 0 : index
    %c0_20 = arith.constant 0 : index
    %22 = vector.load %arg4[%c0_19, %c0_20] : memref<32x192xf32, #tpu.memory_space<vmem>>, vector<32x128xf32>
    tpu.vector_store %arg4[%c0_19, %c0_20], %21 {strides = array<i32>} : memref<32x192xf32, #tpu.memory_space<vmem>>, vector<32x128xf32>,
    %c0_21 = arith.constant 0 : index
    %c0_22 = arith.constant 0 : index
    %23 = vector.load %arg1[%c0_21, %c0_22] : memref<32x64xf32, #tpu.memory_space<vmem>>, vector<32x64xf32>
    %c0_23 = arith.constant 0 : index
    %c128_24 = arith.constant 128 : index
    %24 = vector.load %arg4[%c0_23, %c128_24] : memref<32x192xf32, #tpu.memory_space<vmem>>, vector<32x64xf32>
    tpu.vector_store %arg4[%c0_23, %c128_24], %23 {strides = array<i32>} : memref<32x192xf32, #tpu.memory_space<vmem>>, vector<32x64xf32>,
    return
  }
  func.func @transform_0(%arg0: i32) -> (i32, i32) {
    %c0_i32 = arith.constant 0 : i32
    %c0_i32_0 = arith.constant 0 : i32
    %c0_i32_1 = arith.constant 0 : i32
    return %c0_i32, %c0_i32_0 : i32, i32
  }
  func.func @transform_1(%arg0: i32) -> (i32, i32) {
    %c0_i32 = arith.constant 0 : i32
    %c0_i32_0 = arith.constant 0 : i32
    %c0_i32_1 = arith.constant 0 : i32
    return %c0_i32, %c0_i32_0 : i32, i32
  }
  func.func @transform_2(%arg0: i32) -> (i32, i32) {
    %c0_i32 = arith.constant 0 : i32
    %c0_i32_0 = arith.constant 0 : i32
    %c0_i32_1 = arith.constant 0 : i32
    return %c0_i32, %c0_i32_0 : i32, i32
  }
  func.func @transform_3(%arg0: i32) -> (i32, i32) {
    %c0_i32 = arith.constant 0 : i32
    %c0_i32_0 = arith.constant 0 : i32
    %c0_i32_1 = arith.constant 0 : i32
    return %c0_i32, %c0_i32_0 : i32, i32
  }
}

</mosaic_0001>

<bundles_post_ra>
// kernel: tile.13
= control target key start
LH: loop header
LB: loop body
LE: loop exit
PB: predicated region body
PF: predicated region fallthrough
CT: control target
= control target key end

     0   :  { %s28_s0 = inlined_call_operand.vmem [shape: f32[4], index: 0, kind: input, shape index: {}]   ;;  %s29_s1 = inlined_call_operand.vmem [shape: f32[16,4], index: 1, kind: output, shape index: {}]  }
   0x1   :  { %v4_v0 = vld [vmem:[%s28_s0] ss:$0 sm:$0xff] }
   0x2   :  { %5 = vst [vmem:[%s29_s1] sm:$0xff] %v4_v0  ;;  %8 = vst [vmem:[%s29_s1 + $0x8] sm:$0xff] %v4_v0 }

// kernel: tile.18
= control target key start
LH: loop header
LB: loop body
LE: loop exit
PB: predicated region body
PF: predicated region fallthrough
CT: control target
= control target key end

     0   :  { %s131_s10 = smov 60   ;;  %s132_s11 = smov 52   ;;  %vm3_vm0 = vcmask 31744   ;;  %vm9_vm1 = vcmask 523744   ;;  %vm15_vm2 = vcmask 490944   ;;  %vm21_vm3 = vcmask 458144   ;;  %s207_s0 = inlined_call_operand.vmem [shape: f32[16,4], index: 0, kind: input, shape index: {}]   ;;  %s208_s1 = inlined_call_operand.vmem [shape: f32[1,64], index: 1, kind: output, shape index: {}]  }
   0x1   :  { %v101_v0 = vld [vmem:[%s207_s0 + $0xf] sm:$0x1]   ;;  %v103_v1 = vld [vmem:[%s207_s0 + $0xd] sm:$0x1]   ;;  %v102_v2 = vld [vmem:[%s207_s0 + $0xe] sm:$0x1]  }
   0x2   :  { %7 = vrot.lane.b32.xlu0 %v101_v0, %s131_s10  ;;  %19 = vrot.lane.b32.xlu1 %v103_v1, %s132_s11  ;;  %v104_v3 = vld [vmem:[%s207_s0 + $0xc] sm:$0x1]   ;;  %s133_s16 = smov 56   ;;  %s134_s17 = smov 48   ;;  %v105_v4 = vld [vmem:[%s207_s0 + $0xb] sm:$0x1]  }
   0x3   :  { %v106_v5 = vld [vmem:[%s207_s0 + $0xa] sm:$0x1]   ;;  %v2_v6 = vld [vmem:[%s207_s0] sm:$0x1]   ;;  %s135_s24 = smov 44   ;;  %s136_s25 = smov 40  }
   0x4   :  { %4 = vst.msk [vmem:[#allocation0] sm:$0x1] %vm3_vm0, %v2_v6   ;;  %v107_v7 = vld [vmem:[%s207_s0 + $0x9] sm:$0x1]   ;;  %v108_v8 = vld [vmem:[%s207_s0 + $0x8] sm:$0x1]  }
   0x5   :  { %s137_s30 = smov 36   ;;  %s138_s2 = smov 32   ;;  %v109_v9 = vld [vmem:[%s207_s0 + $0x7] sm:$0x1]   ;;  %v110_v10 = vld [vmem:[%s207_s0 + $0x6] sm:$0x1]  }
   0x6   :  { %13 = vrot.lane.b32.xlu0 %v102_v2, %s133_s16  ;;  %25 = vrot.lane.b32.xlu1 %v104_v3, %s134_s17  ;;  %s139_s7 = smov 28   ;;  %s140_s8 = smov 24   ;;  %v111_v11 = vld [vmem:[%s207_s0 + $0x5] sm:$0x1]   ;;  %v112_v12 = vld [vmem:[%s207_s0 + $0x4] sm:$0x1]  }
   0x7   :  { %s141_s13 = smov 20   ;;  %s142_s14 = smov 16   ;;  %v113_v13 = vld [vmem:[%s207_s0 + $0x3] sm:$0x1]   ;;  %v114_v14 = vld [vmem:[%s207_s0 + $0x2] sm:$0x1]  }
   0x8   :  { %s143_s19 = smov 12   ;;  %s144_s20 = smov 8   ;;  %v115_v15 = vld [vmem:[%s207_s0 + $0x1] sm:$0x1]   ;;  %vm27_vm4 = vcmask 425344   ;;  %vm33_vm5 = vcmask 392544  }
   0x9   :  { %s145_s0 = smov 4   ;;  %vm39_vm6 = vcmask 359744   ;;  %vm45_vm7 = vcmask 326944   ;;  %vm51_vm8 = vcmask 294144   ;;  %vm57_vm9 = vcmask 261344  }
   0xa   :  { %31 = vrot.lane.b32.xlu0 %v105_v4, %s135_s24  ;;  %37 = vrot.lane.b32.xlu1 %v106_v5, %s136_s25  ;;  %vm63_vm10 = vcmask 228544   ;;  %vm69_vm11 = vcmask 195744   ;;  %vm75_vm12 = vcmask 162944   ;;  %vm81_vm13 = vcmask 130144  }
   0xb   :  { %vm87_vm14 = vcmask 97344   ;;  %vm93_vm15 = vcmask 64544  }
   0xe   :  { %43 = vrot.lane.b32.xlu0 %v107_v7, %s137_s30  ;;  %49 = vrot.lane.b32.xlu1 %v108_v8, %s138_s2 }
  0x12   :  { %55 = vrot.lane.b32.xlu0 %v109_v9, %s139_s7  ;;  %61 = vrot.lane.b32.xlu1 %v110_v10, %s140_s8 }
  0x16   :  { %67 = vrot.lane.b32.xlu0 %v111_v11, %s141_s13  ;;  %73 = vrot.lane.b32.xlu1 %v112_v12, %s142_s14 }
  0x1a   :  { %79 = vrot.lane.b32.xlu0 %v113_v13, %s143_s19  ;;  %85 = vrot.lane.b32.xlu1 %v114_v14, %s144_s20 }
  0x1e   :  { %91 = vrot.lane.b32.xlu0 %v115_v15, %s145_s0 }
  0x74   :  { %v8_v16 = vpop.permute.xlu0 %7   ;;  %v20_v17 = vpop.permute.xlu1 %19  }
  0x75   :  { %10 = vst.msk [vmem:[#allocation0] sm:$0x1] %vm9_vm1, %v8_v16  }
  0x78   :  { %v14_v18 = vpop.permute.xlu0 %13   ;;  %v26_v19 = vpop.permute.xlu1 %25  }
  0x79   :  { %16 = vst.msk [vmem:[#allocation0] sm:$0x1] %vm15_vm2, %v14_v18  }
  0x7a   :  { %22 = vst.msk [vmem:[#allocation0] sm:$0x1] %vm21_vm3, %v20_v17  }
  0x7b   :  { %28 = vst.msk [vmem:[#allocation0] sm:$0x1] %vm27_vm4, %v26_v19  }
  0x7c   :  { %v32_v20 = vpop.permute.xlu0 %31   ;;  %v38_v21 = vpop.permute.xlu1 %37  }
  0x7d   :  { %34 = vst.msk [vmem:[#allocation0] sm:$0x1] %vm33_vm5, %v32_v20  }
  0x7e   :  { %40 = vst.msk [vmem:[#allocation0] sm:$0x1] %vm39_vm6, %v38_v21  }
  0x80   :  { %v44_v22 = vpop.permute.xlu0 %43   ;;  %v50_v23 = vpop.permute.xlu1 %49  }
  0x81   :  { %46 = vst.msk [vmem:[#allocation0] sm:$0x1] %vm45_vm7, %v44_v22  }
  0x82   :  { %52 = vst.msk [vmem:[#allocation0] sm:$0x1] %vm51_vm8, %v50_v23  }
  0x84   :  { %v56_v24 = vpop.permute.xlu0 %55   ;;  %v62_v25 = vpop.permute.xlu1 %61  }
  0x85   :  { %58 = vst.msk [vmem:[#allocation0] sm:$0x1] %vm57_vm9, %v56_v24  }
  0x86   :  { %64 = vst.msk [vmem:[#allocation0] sm:$0x1] %vm63_vm10, %v62_v25  }
  0x88   :  { %v68_v26 = vpop.permute.xlu0 %67   ;;  %v74_v27 = vpop.permute.xlu1 %73  }
  0x89   :  { %70 = vst.msk [vmem:[#allocation0] sm:$0x1] %vm69_vm11, %v68_v26  }
  0x8a   :  { %76 = vst.msk [vmem:[#allocation0] sm:$0x1] %vm75_vm12, %v74_v27  }
  0x8c   :  { %v80_v28 = vpop.permute.xlu0 %79   ;;  %v86_v29 = vpop.permute.xlu1 %85  }
  0x8d   :  { %82 = vst.msk [vmem:[#allocation0] sm:$0x1] %vm81_vm13, %v80_v28  }
  0x8e   :  { %88 = vst.msk [vmem:[#allocation0] sm:$0x1] %vm87_vm14, %v86_v29  }
  0x90   :  { %v92_v30 = vpop.permute.xlu0 %91  }
  0x91   :  { %94 = vst.msk [vmem:[#allocation0] sm:$0x1] %vm93_vm15, %v92_v30  }
  0x98   :  { %v98_v31 = vld [vmem:[#allocation0] sm:$0x1] }
  0x99   :  { %100 = vst [vmem:[%s208_s1] sm:$0x1] %v98_v31 }

// kernel: resnet_block_forward.1
= control target key start
LH: loop header
LB: loop body
LE: loop exit
PB: predicated region body
PF: predicated region fallthrough
CT: control target
= control target key end

     0   :  { %v315_v3 = vmov 0.0|0.0   ;;  %vm96_vm0 = vcmask 516096   ;;  %v316_v14 = vmov 0.0   ;;  %vm75_vm1 = vcmask 523264   ;;  %s317_s7 = smov 64   ;;  %s543_s0 = inlined_call_operand.vmem [shape: f32[32,64], index: 0, kind: input, shape index: {}]   ;;  %s544_s2 = inlined_call_operand.vmem [shape: f32[2,64], index: 2, kind: input, shape index: {}]   ;;  %s545_s1 = inlined_call_operand.vmem [shape: f32[192,128], index: 1, kind: input, shape index: {}]   ;;  %s546_s3 = inlined_call_operand.vmem [shape: f32[32,192], index: 3, kind: output, shape index: {}]  }
   0x1   :  { %v341_v0 = vld [vmem:[%s543_s0 + $0x10] sm:$0xff]  ;;  %v246_v1 = vld [vmem:[%s544_s2] ss:$0 sm:$0xff]  ;;  %v247_v2 = vld [vmem:[%s544_s2 + $0x1] ss:$0 sm:$0xff]  ;;  %288 = vmatprep.subr.bf16.mxu1 %v315_v3  ;;  %252 = vmatprep.subr.bf16.mxu0 %v315_v3  ;;  %vm79_vm2 = vcmask 1046528  }
   0x2   :  { %v25_v4 = vmul.f32 %v246_v1, %v341_v0  ;;  %v355_v5 = vld [vmem:[%s543_s0 + $0x8] sm:$0xff]  ;;  %v360_v6 = vld [vmem:[%s543_s0] sm:$0xff]  ;;  %v365_v7 = vld [vmem:[%s543_s0 + $0x18] sm:$0xff]  ;;  %100 = vst.msk [vmem:[#allocation2 + $0x3f] sm:$0x1] %vm96_vm0, %v316_v14  ;;  %vm61_vm3 = vcmask 1040384  }
   0x3   :  { %v24_v8 = vmul.f32 %v246_v1, %v355_v5  ;;  %v23_v9 = vmul.f32 %v246_v1, %v360_v6  ;;  %v26_v10 = vmul.f32 %v246_v1, %v365_v7  ;;  %v109_v11 = vld [vmem:[%s545_s1] sm:$0xff]  ;;  %v110_v12 = vld [vmem:[%s545_s1 + $0x8] sm:$0xff]  ;;  %v111_v13 = vld [vmem:[%s545_s1 + $0x10] sm:$0xff]  ;;  %vm94_vm4 = vcmask 522240   ;;  %238 = vst.msk [vmem:[%s546_s3 + $0x8] sm:$0xff] %vm75_vm1, %v360_v6 }
   0x4   :  { %v34_v15 = vadd.f32 %v247_v2, %v25_v4  ;;  %v253_v16 = vpack.c.bf16 %v110_v12, %v109_v11  ;;  %v112_v17 = vld [vmem:[%s545_s1 + $0x18] sm:$0xff]  ;;  %v113_v25 = vld [vmem:[%s545_s1 + $0x20] sm:$0xff]  ;;  %v114_v26 = vld [vmem:[%s545_s1 + $0x28] sm:$0xff]  ;;  %239 = vst.msk [vmem:[%s546_s3 + $0x18] sm:$0xff] %vm75_vm1, %v355_v5  ;;  %vm56_vm5 = vcmask 1048064   ;;  %vm73_vm6 = vcmask 523265  }
   0x5   :  { %v33_v18 = vadd.f32 %v247_v2, %v24_v8  ;;  %v32_v19 = vadd.f32 %v247_v2, %v23_v9  ;;  %v35_v20 = vadd.f32 %v247_v2, %v26_v10  ;;  %v256_v22 = vpack.c.bf16 %v112_v17, %v111_v13  ;;  %v115_v39 = vld [vmem:[%s545_s1 + $0x30] sm:$0xff]  ;;  %v116_v40 = vld [vmem:[%s545_s1 + $0x38] sm:$0xff]  ;;  %240 = vst.msk [vmem:[%s546_s3 + $0x28] sm:$0xff] %vm75_vm1, %v341_v0  ;;  %v117_v46 = vld [vmem:[%s545_s1 + $0x40] sm:$0xff] }
   0x6   :  { %v38_v21 = vmax.f32 %v34_v15, 0.0  ;;  %300 = vmatpush1.bf16.msra.mxu1 %v253_v16  ;;  %254 = vmatpush1.bf16.msra.mxu0 %v253_v16  ;;  %v259_v36 = vpack.c.bf16 %v114_v26, %v113_v25  ;;  %241 = vst.msk [vmem:[%s546_s3 + $0x38] sm:$0xff] %vm75_vm1, %v365_v7  ;;  %v262_v45 = vpack.c.bf16 %v116_v40, %v115_v39  ;;  %v118_v47 = vld [vmem:[%s545_s1 + $0x48] sm:$0xff]  ;;  %v119_v49 = vld [vmem:[%s545_s1 + $0x50] sm:$0xff]  ;;  %v120_v50 = vld [vmem:[%s545_s1 + $0x58] sm:$0xff] }
   0x7   :  { %v37_v23 = vmax.f32 %v33_v18, 0.0  ;;  %v384_v24 = vmax.f32 %v32_v19, 0.0  ;;  %289 = vmatprep.subr.bf16.mxu1 %v315_v3  ;;  %255 = vmatprep.subr.bf16.mxu0 %v315_v3  ;;  %v39_v29 = vmax.f32 %v35_v20, 0.0  ;;  %v265_v48 = vpack.c.bf16 %v118_v47, %v117_v46  ;;  %v121_v54 = vld [vmem:[%s545_s1 + $0x60] sm:$0xff]  ;;  %v122_v55 = vld [vmem:[%s545_s1 + $0x68] sm:$0xff]  ;;  %v123_v57 = vld [vmem:[%s545_s1 + $0x70] sm:$0xff] }
   0x8   :  { %48 = vrot.lane.b32.xlu0 %v38_v21, %s317_s7  ;;  %v65_v27 = vrot.slane %v38_v21, 7  ;;  %v83_v28 = vrot.slane %v38_v21, 1  ;;  %v268_v53 = vpack.c.bf16 %v120_v50, %v119_v49  ;;  %v271_v56 = vpack.c.bf16 %v122_v55, %v121_v54  ;;  %v124_v58 = vld [vmem:[%s545_s1 + $0x78] sm:$0xff]  ;;  %v125_v60 = vld [vmem:[%s545_s1 + $0x80] sm:$0xff]  ;;  %v126_v61 = vld [vmem:[%s545_s1 + $0x88] sm:$0xff] }
   0x9   :  { %46 = vrot.lane.b32.xlu1 %v37_v23, %s317_s7  ;;  %v63_v30 = vrot.slane %v37_v23, 7  ;;  %v81_v31 = vrot.slane %v37_v23, 1  ;;  %v80_v32 = vrot.slane %v384_v24, 1  ;;  %v62_v33 = vrot.slane %v384_v24, 7  ;;  %v127_v63 = vld [vmem:[%s545_s1 + $0x90] sm:$0xff]  ;;  %v128_v0 = vld [vmem:[%s545_s1 + $0x98] sm:$0xff] }
   0xa   :  { %v67_v34 = vrot.slane %v39_v29, 7  ;;  %v85_v35 = vrot.slane %v39_v29, 1  ;;  %301 = vmatpush1.bf16.msra.mxu1 %v256_v22  ;;  %257 = vmatpush1.bf16.msra.mxu0 %v256_v22  ;;  %v274_v59 = vpack.c.bf16 %v124_v58, %v123_v57  ;;  %v277_v62 = vpack.c.bf16 %v126_v61, %v125_v60  ;;  %v129_v2 = vld [vmem:[%s545_s1 + $0xa0] sm:$0xff]  ;;  %v130_v4 = vld [vmem:[%s545_s1 + $0xa8] sm:$0xff]  ;;  %v131_v6 = vld [vmem:[%s545_s1 + $0xb0] sm:$0xff] }
   0xb   :  { %v84_v37 = vsel %vm79_vm2, %v81_v31, %v83_v28  ;;  %v82_v38 = vsel %vm79_vm2, %v80_v32, %v81_v31  ;;  %290 = vmatprep.subr.bf16.mxu1 %v315_v3  ;;  %258 = vmatprep.subr.bf16.mxu0 %v315_v3  ;;  %v409_v41 = vsel %vm61_vm3, %v63_v30, %v65_v27  ;;  %v132_v7 = vld [vmem:[%s545_s1 + $0xb8] sm:$0xff] }
   0xc   :  { %92 = vst.msk [vmem:[#allocation2 + $0x18] sm:$0xff] %vm75_vm1, %v84_v37  ;;  %44 = vrot.lane.b32.xlu0 %v384_v24, %s317_s7  ;;  %91 = vst.msk [vmem:[#allocation2 + $0x8] sm:$0xff] %vm75_vm1, %v82_v38  ;;  %v86_v42 = vsel %vm79_vm2, %v83_v28, %v85_v35  ;;  %v420_v43 = vsel %vm61_vm3, %v62_v33, %v63_v30  ;;  %v427_v44 = vsel %vm61_vm3, %v65_v27, %v67_v34 }
   0xd   :  { %95 = vst.msk [vmem:[#allocation2 + $0x38] sm:$0x7f] %vm94_vm4, %v85_v35  ;;  %50 = vrot.lane.b32.xlu1 %v39_v29, %s317_s7  ;;  %v280_v1 = vpack.c.bf16 %v128_v0, %v127_v63  ;;  %v283_v5 = vpack.c.bf16 %v130_v4, %v129_v2  ;;  %v286_v8 = vpack.c.bf16 %v132_v7, %v131_v6 }
   0xe   :  { %93 = vst.msk [vmem:[#allocation2 + $0x28] sm:$0xff] %vm75_vm1, %v86_v42  ;;  %302 = vmatpush1.bf16.msra.mxu1 %v259_v36  ;;  %260 = vmatpush1.bf16.msra.mxu0 %v259_v36 }
   0xf   :  { %98 = vst.msk [vmem:[#allocation2 + $0x1f] sm:$0x1] %vm96_vm0, %v316_v14  ;;  %291 = vmatprep.subr.bf16.mxu1 %v315_v3  ;;  %261 = vmatprep.subr.bf16.mxu0 %v315_v3 }
  0x12   :  { %303 = vmatpush1.bf16.msra.mxu1 %v262_v45  ;;  %263 = vmatpush1.bf16.msra.mxu0 %v262_v45 }
  0x13   :  { %292 = vmatprep.subr.bf16.mxu1 %v315_v3  ;;  %264 = vmatprep.subr.bf16.mxu0 %v315_v3  ;;  %v102_v51 = vld [vmem:[#allocation2 + $0x8] sm:$0xff] }
  0x14   :  { %248 = vmatprep.mubr.msk.f32.mxu0 %vm75_vm1, %v102_v51  ;;  %v108_v12 = vld [vmem:[#allocation2 + $0x38] sm:$0xff] }
  0x15   :  { %v106_v52 = vld [vmem:[#allocation2 + $0x28] sm:$0xff] }
  0x16   :  { %250 = vmatprep.mubr.msk.f32.mxu1 %vm75_vm1, %v106_v52  ;;  %304 = vmatpush1.bf16.msra.mxu1 %v265_v48  ;;  %v104_v15 = vld [vmem:[#allocation2 + $0x18] sm:$0xff] }
  0x17   :  { %266 = vmatpush1.bf16.msra.mxu0 %v265_v48  ;;  %293 = vmatprep.subr.bf16.mxu1 %v315_v3 }
  0x18   :  { %267 = vmatprep.subr.bf16.mxu0 %v315_v3 }
  0x1a   :  { %305 = vmatpush1.bf16.msra.mxu1 %v268_v53 }
  0x1b   :  { %269 = vmatpush1.bf16.msra.mxu0 %v268_v53  ;;  %294 = vmatprep.subr.bf16.mxu1 %v315_v3 }
  0x1c   :  { %270 = vmatprep.subr.bf16.mxu0 %v315_v3 }
  0x1e   :  { %306 = vmatpush1.bf16.msra.mxu1 %v271_v56 }
  0x1f   :  { %272 = vmatpush1.bf16.msra.mxu0 %v271_v56  ;;  %295 = vmatprep.subr.bf16.mxu1 %v315_v3 }
  0x20   :  { %273 = vmatprep.subr.bf16.mxu0 %v315_v3 }
  0x22   :  { %307 = vmatpush1.bf16.msra.mxu1 %v274_v59 }
  0x23   :  { %275 = vmatpush1.bf16.msra.mxu0 %v274_v59  ;;  %296 = vmatprep.subr.bf16.mxu1 %v315_v3 }
  0x24   :  { %276 = vmatprep.subr.bf16.mxu0 %v315_v3 }
  0x26   :  { %308 = vmatpush1.bf16.msra.mxu1 %v277_v62 }
  0x27   :  { %278 = vmatpush1.bf16.msra.mxu0 %v277_v62  ;;  %297 = vmatprep.subr.bf16.mxu1 %v315_v3 }
  0x28   :  { %279 = vmatprep.subr.bf16.mxu0 %v315_v3 }
  0x2a   :  { %309 = vmatpush1.bf16.msra.mxu1 %v280_v1 }
  0x2b   :  { %281 = vmatpush1.bf16.msra.mxu0 %v280_v1  ;;  %298 = vmatprep.subr.bf16.mxu1 %v315_v3 }
  0x2c   :  { %282 = vmatprep.subr.bf16.mxu0 %v315_v3 }
  0x2e   :  { %310 = vmatpush1.bf16.msra.mxu1 %v283_v5 }
  0x2f   :  { %284 = vmatpush1.bf16.msra.mxu0 %v283_v5  ;;  %299 = vmatprep.subr.bf16.mxu1 %v315_v3 }
  0x30   :  { %285 = vmatprep.subr.bf16.mxu0 %v315_v3 }
  0x32   :  { %311 = vmatpush1.bf16.msra.mxu1 %v286_v8 }
  0x33   :  { %287 = vmatpush1.bf16.msra.mxu0 %v286_v8 }
  0x7a   :  { %v49_v9 = vpop.permute.xlu0 %48 }
  0x7b   :  { %59 = vst.msk [vmem:[#allocation2 + $0x20] sm:$0xff] %vm56_vm5, %v49_v9  ;;  %v47_v10 = vpop.permute.xlu1 %46 }
  0x7c   :  { %77 = vst.msk [vmem:[#allocation2 + $0x20] sm:$0xff] %vm75_vm1, %v409_v41 }
  0x7d   :  { %58 = vst.msk [vmem:[#allocation2 + $0x10] sm:$0xff] %vm56_vm5, %v47_v10 }
  0x7e   :  { %99 = vst.msk [vmem:[#allocation2 + $0x20] sm:$0x1] %vm96_vm0, %v316_v14  ;;  %v45_v11 = vpop.permute.xlu0 %44 }
  0x7f   :  { %76 = vst.msk [vmem:[#allocation2 + $0x10] sm:$0xff] %vm75_vm1, %v420_v43  ;;  %v51_v3 = vpop.permute.xlu1 %50 }
  0x80   :  { %57 = vst.msk [vmem:[#allocation2] sm:$0xff] %vm56_vm5, %v45_v11  ;;  %60 = vst.msk [vmem:[#allocation2 + $0x30] sm:$0xff] %vm56_vm5, %v51_v3 }
  0x81   :  { %74 = vst.msk [vmem:[#allocation2] sm:$0xfe] %vm73_vm6, %v62_v33 }
  0x82   :  { %97 = vst.msk [vmem:[#allocation2] sm:$0x1] %vm96_vm0, %v316_v14 }
  0x83   :  { %78 = vst.msk [vmem:[#allocation2 + $0x30] sm:$0xff] %vm75_vm1, %v427_v44 }
  0x85   :  { %v105_v13 = vld [vmem:[#allocation2 + $0x20] sm:$0xff] }
  0x86   :  { %220 = vmatmul.mubr.f32.vlgmr.msra.gmra.mrb[0].mxu1 %v105_v13  ;;  %v103_v18 = vld [vmem:[#allocation2 + $0x10] sm:$0xff] }
  0x87   :  { %251 = vmatprep.mubr.msk.f32.mxu1 %vm75_vm1, %v108_v12 }
  0x89   :  { %v101_v16 = vld [vmem:[#allocation2] sm:$0xff] }
  0x8a   :  { %210 = vmatmul.mubr.f32.vlgmr.msra.gmra.mrb[0].mxu0 %v101_v16  ;;  %v107_v17 = vld [vmem:[#allocation2 + $0x30] sm:$0xff] }
  0x8b   :  { %249 = vmatprep.mubr.msk.f32.mxu0 %vm75_vm1, %v104_v15  ;;  %225 = vmatmul.mubr.f32.gmra.mrb[2].mxu1 %v107_v17 }
  0x8e   :  { %215 = vmatmul.mubr.f32.gmra.mrb[2].mxu0 %v103_v18 }
 0x159   :  { %v221_v19 = vpop.f32.mrb[0].mxu1 }
 0x15a   :  { %232 = vst [vmem:[%s546_s3 + $0x20] sm:$0xff] %v221_v19  ;;  %v223_v14 = vpop.f32.mrb[1].mxu1 }
 0x15d   :  { %v211_v20 = vpop.f32.mrb[0].mxu0 }
 0x15e   :  { %230 = vst [vmem:[%s546_s3] sm:$0xff] %v211_v20  ;;  %v213_v21 = vpop.f32.mrb[1].mxu0  ;;  %v226_v22 = vpop.f32.mrb[2].mxu1 }
 0x15f   :  { %233 = vst [vmem:[%s546_s3 + $0x30] sm:$0xff] %v226_v22  ;;  %v228_v23 = vpop.f32.mrb[3].mxu1 }
 0x161   :  { %v216_v24 = vpop.f32.mrb[2].mxu0 }
 0x162   :  { %231 = vst [vmem:[%s546_s3 + $0x10] sm:$0xff] %v216_v24  ;;  %v218_v25 = vpop.f32.mrb[3].mxu0 }

</bundles_post_ra>
